<compile_context>
chip_gen: v7x
topology: tpu7x:2x2x1
jax: 0.10.0
libtpu: 0.0.40
codegen_flags: <defaults>
</compile_context>

<pallas_src>
import jax
import jax.numpy as jnp
from jax.experimental import pallas as pl
from jax.experimental.pallas import tpu as pltpu

A_LAYER1_NUM = 64
A_LAYER2_NUM = 128
A_LAYER3_NUM = 256
A_LAYER4_NUM = 128
A_LAYER5_NUM = 64

_N_LAYERS = 6


def _round_up(x, m):
    return ((x + m - 1) // m) * m


def _mlp_kernel(x_ref, w_ref, b_ref, out_ref):
    # x_ref:   [TB, D]       f32   (current batch tile, zero-padded features)
    # w_ref:   [6, D, D]     bf16  (zero-padded weight slab, VMEM-resident)
    # b_ref:   [6, 1, D]     f32   (zero-padded bias slab)
    # out_ref: [TB, D]       f32   (lane-dense padded output)
    h = x_ref[...]                                    # f32
    for layer in range(_N_LAYERS):
        y = jnp.dot(h.astype(jnp.bfloat16),           # bf16 MXU operands
                    w_ref[layer],                     # static slice -> [D, D]
                    preferred_element_type=jnp.float32)
        y = y + b_ref[layer]                          # [1, D] f32 broadcast
        h = jnp.maximum(y, 0.0) if layer < _N_LAYERS - 1 else y
    out_ref[...] = h


def pack_params(params, n_states_a, n_actions_a):
    """Pack per-layer (W, b) into one bf16 weight slab and one f32 bias slab,
    zero-padded to a common D_PAD (>=256, multiple of 128). Do this once."""
    dims = [n_states_a, A_LAYER1_NUM, A_LAYER2_NUM, A_LAYER3_NUM,
            A_LAYER4_NUM, A_LAYER5_NUM, n_actions_a]
    d_pad = max(256, max(_round_up(d, 128) for d in dims))
    names = ["1", "2", "3", "4", "5", "o"]

    w_slab = jnp.zeros((_N_LAYERS, d_pad, d_pad), jnp.bfloat16)
    b_slab = jnp.zeros((_N_LAYERS, 1, d_pad), jnp.float32)
    for i, (name, fan_in, fan_out) in enumerate(zip(names, dims[:-1], dims[1:])):
        w = params[f"w{name}"].astype(jnp.bfloat16)           # [in, out]
        b = params[f"b{name}"].astype(jnp.float32).reshape(1, fan_out)
        w_slab = w_slab.at[i, :fan_in, :fan_out].set(w)
        b_slab = b_slab.at[i, :, :fan_out].set(b)
    return w_slab, b_slab, d_pad


def assignment_net_forward(x, w_slab, b_slab, n_actions_a):
    """x: [B, n_states_a] float32. Returns [B, n_actions_a] float32."""
    B, n_feat = x.shape
    d_pad = w_slab.shape[-1]

    # Batch tile: multiple of 8, capped at 256 (well within VMEM / vreg budget
    # on all generations; per-grid-step overhead amortized).
    tb = min(256, _round_up(max(B, 1), 8))
    b_pad = _round_up(B, tb)

    x_pad = jnp.zeros((b_pad, d_pad), jnp.float32)
    x_pad = x_pad.at[:B, :n_feat].set(x.astype(jnp.float32))

    out_pad = pl.pallas_call(
        _mlp_kernel,
        out_shape=jax.ShapeDtypeStruct((b_pad, d_pad), jnp.float32),
        grid=(b_pad // tb,),
        in_specs=[
            # batch-tiled activation
            pl.BlockSpec((tb, d_pad), lambda i: (i, 0)),
            # weight slab: constant block index -> stays VMEM-resident
            pl.BlockSpec((_N_LAYERS, d_pad, d_pad), lambda i: (0, 0, 0)),
            # bias slab: constant block index -> stays VMEM-resident
            pl.BlockSpec((_N_LAYERS, 1, d_pad), lambda i: (0, 0, 0)),
        ],
        out_specs=pl.BlockSpec((tb, d_pad), lambda i: (i, 0)),
        compiler_params=pltpu.CompilerParams(
            dimension_semantics=("parallel",)),
    )(x_pad, w_slab, b_slab)

    return out_pad[:B, :n_actions_a]


def init_params(key, n_states_a, n_actions_a):
    """Synthetic init mirroring the PyTorch module: weights ~ N(0, 0.1),
    biases ~ U(-1/sqrt(fan_in), 1/sqrt(fan_in)). Weights stored [in, out]."""
    dims = [n_states_a, A_LAYER1_NUM, A_LAYER2_NUM, A_LAYER3_NUM,
            A_LAYER4_NUM, A_LAYER5_NUM, n_actions_a]
    names = ["1", "2", "3", "4", "5", "o"]
    params = {}
    for name, fan_in, fan_out in zip(names, dims[:-1], dims[1:]):
        key, kw, kb = jax.random.split(key, 3)
        params[f"w{name}"] = 0.1 * jax.random.normal(
            kw, (fan_in, fan_out), dtype=jnp.float32)
        bound = 1.0 / jnp.sqrt(jnp.float32(fan_in))
        params[f"b{name}"] = jax.random.uniform(
            kb, (1, fan_out), dtype=jnp.float32, minval=-bound, maxval=bound)
    return params


def reference_forward(x, params):
    """Pure-JAX reference mirroring the kernel's bf16-operand / f32-accumulate
    math (bias-add and ReLU in f32)."""
    h = x.astype(jnp.float32)
    for name in ["1", "2", "3", "4", "5"]:
        y = jnp.dot(h.astype(jnp.bfloat16),
                    params[f"w{name}"].astype(jnp.bfloat16),
                    preferred_element_type=jnp.float32) + params[f"b{name}"]
        h = jnp.maximum(y, 0.0)
    return jnp.dot(h.astype(jnp.bfloat16),
                   params["wo"].astype(jnp.bfloat16),
                   preferred_element_type=jnp.float32) + params["bo"]


if __name__ == "__main__":
    key = jax.random.PRNGKey(0)
    n_states_a = 32
    n_actions_a = 8
    batch = 2

    key, kp, kx = jax.random.split(key, 3)
    params = init_params(kp, n_states_a, n_actions_a)
    x = jax.random.normal(kx, (batch, n_states_a), dtype=jnp.float32)

    w_slab, b_slab, _ = pack_params(params, n_states_a, n_actions_a)

    out = assignment_net_forward(x, w_slab, b_slab, n_actions_a)
    out = jax.block_until_ready(out)

    ref = reference_forward(x, params)
    assert out.shape == (batch, n_actions_a), out.shape
    max_err = float(jnp.max(jnp.abs(out - ref)))
    assert max_err < 1e-2, max_err

    print("KERNEL_OK")
</pallas_src>

<mosaic_0001>
module attributes {stable_mosaic.version = 11 : i64} {
  func.func @_mlp_kernel(%arg0: i32, %arg1: memref<8x256xf32, #tpu.memory_space<vmem>>, %arg2: memref<6x256x256xbf16, #tpu.memory_space<vmem>>, %arg3: memref<6x1x256xf32, #tpu.memory_space<vmem>>, %arg4: memref<8x256xf32, #tpu.memory_space<vmem>>) attributes {dimension_semantics = [#tpu.dimension_semantics<parallel>], iteration_bounds = array<i64: 1>, scalar_prefetch = 0 : i64, scratch_operands = 0 : i64, tpu.core_type = #tpu.core_type<tc>, window_params = [{transform_indices = @transform_0, window_bounds = array<i64: 8, 256>}, {pipeline_mode = #tpu.pipeline_mode<synchronous>, transform_indices = @transform_1, window_bounds = array<i64: 6, 256, 256>}, {pipeline_mode = #tpu.pipeline_mode<synchronous>, transform_indices = @transform_2, window_bounds = array<i64: 6, 1, 256>}, {transform_indices = @transform_3, window_bounds = array<i64: 8, 256>}]} {
    %c0 = arith.constant 0 : index
    %c0_0 = arith.constant 0 : index
    %0 = vector.load %arg1[%c0, %c0_0] : memref<8x256xf32, #tpu.memory_space<vmem>>, vector<8x256xf32>
    %1 = arith.truncf %0 : vector<8x256xf32> to vector<8x256xbf16>
    %c0_1 = arith.constant 0 : index
    %c0_2 = arith.constant 0 : index
    %c0_3 = arith.constant 0 : index
    %2 = vector.load %arg2[%c0_1, %c0_2, %c0_3] : memref<6x256x256xbf16, #tpu.memory_space<vmem>>, vector<1x256x256xbf16>
    %3 = vector.shape_cast %2 : vector<1x256x256xbf16> to vector<256x256xbf16>
    %cst = arith.constant dense<0.000000e+00> : vector<8x256xf32>
    %4 = tpu.matmul %1, %3, %cst {dimension_numbers = #tpu.dot_dimension_numbers<[1], [0], [0], [1], [0, 0, 1, 1], [], []>} : vector<8x256xbf16>, vector<256x256xbf16>, vector<8x256xf32> -> vector<8x256xf32>
    %c0_4 = arith.constant 0 : index
    %c0_5 = arith.constant 0 : index
    %c0_6 = arith.constant 0 : index
    %5 = vector.load %arg3[%c0_4, %c0_5, %c0_6] : memref<6x1x256xf32, #tpu.memory_space<vmem>>, vector<1x1x256xf32>
    %6 = vector.shape_cast %5 : vector<1x1x256xf32> to vector<1x256xf32>
    %7 = vector.broadcast %6 : vector<1x256xf32> to vector<8x256xf32>
    %8 = arith.addf %4, %7 : vector<8x256xf32>
    %cst_7 = arith.constant 0.000000e+00 : f32
    %9 = vector.broadcast %cst_7 : f32 to vector<8x256xf32>
    %10 = arith.maximumf %8, %9 : vector<8x256xf32>
    %11 = arith.truncf %10 : vector<8x256xf32> to vector<8x256xbf16>
    %c1 = arith.constant 1 : index
    %c0_8 = arith.constant 0 : index
    %c0_9 = arith.constant 0 : index
    %12 = vector.load %arg2[%c1, %c0_8, %c0_9] : memref<6x256x256xbf16, #tpu.memory_space<vmem>>, vector<1x256x256xbf16>
    %13 = vector.shape_cast %12 : vector<1x256x256xbf16> to vector<256x256xbf16>
    %cst_10 = arith.constant dense<0.000000e+00> : vector<8x256xf32>
    %14 = tpu.matmul %11, %13, %cst_10 {dimension_numbers = #tpu.dot_dimension_numbers<[1], [0], [0], [1], [0, 0, 1, 1], [], []>} : vector<8x256xbf16>, vector<256x256xbf16>, vector<8x256xf32> -> vector<8x256xf32>
    %c1_11 = arith.constant 1 : index
    %c0_12 = arith.constant 0 : index
    %c0_13 = arith.constant 0 : index
    %15 = vector.load %arg3[%c1_11, %c0_12, %c0_13] : memref<6x1x256xf32, #tpu.memory_space<vmem>>, vector<1x1x256xf32>
    %16 = vector.shape_cast %15 : vector<1x1x256xf32> to vector<1x256xf32>
    %17 = vector.broadcast %16 : vector<1x256xf32> to vector<8x256xf32>
    %18 = arith.addf %14, %17 : vector<8x256xf32>
    %cst_14 = arith.constant 0.000000e+00 : f32
    %19 = vector.broadcast %cst_14 : f32 to vector<8x256xf32>
    %20 = arith.maximumf %18, %19 : vector<8x256xf32>
    %21 = arith.truncf %20 : vector<8x256xf32> to vector<8x256xbf16>
    %c2 = arith.constant 2 : index
    %c0_15 = arith.constant 0 : index
    %c0_16 = arith.constant 0 : index
    %22 = vector.load %arg2[%c2, %c0_15, %c0_16] : memref<6x256x256xbf16, #tpu.memory_space<vmem>>, vector<1x256x256xbf16>
    %23 = vector.shape_cast %22 : vector<1x256x256xbf16> to vector<256x256xbf16>
    %cst_17 = arith.constant dense<0.000000e+00> : vector<8x256xf32>
    %24 = tpu.matmul %21, %23, %cst_17 {dimension_numbers = #tpu.dot_dimension_numbers<[1], [0], [0], [1], [0, 0, 1, 1], [], []>} : vector<8x256xbf16>, vector<256x256xbf16>, vector<8x256xf32> -> vector<8x256xf32>
    %c2_18 = arith.constant 2 : index
    %c0_19 = arith.constant 0 : index
    %c0_20 = arith.constant 0 : index
    %25 = vector.load %arg3[%c2_18, %c0_19, %c0_20] : memref<6x1x256xf32, #tpu.memory_space<vmem>>, vector<1x1x256xf32>
    %26 = vector.shape_cast %25 : vector<1x1x256xf32> to vector<1x256xf32>
    %27 = vector.broadcast %26 : vector<1x256xf32> to vector<8x256xf32>
    %28 = arith.addf %24, %27 : vector<8x256xf32>
    %cst_21 = arith.constant 0.000000e+00 : f32
    %29 = vector.broadcast %cst_21 : f32 to vector<8x256xf32>
    %30 = arith.maximumf %28, %29 : vector<8x256xf32>
    %31 = arith.truncf %30 : vector<8x256xf32> to vector<8x256xbf16>
    %c3 = arith.constant 3 : index
    %c0_22 = arith.constant 0 : index
    %c0_23 = arith.constant 0 : index
    %32 = vector.load %arg2[%c3, %c0_22, %c0_23] : memref<6x256x256xbf16, #tpu.memory_space<vmem>>, vector<1x256x256xbf16>
    %33 = vector.shape_cast %32 : vector<1x256x256xbf16> to vector<256x256xbf16>
    %cst_24 = arith.constant dense<0.000000e+00> : vector<8x256xf32>
    %34 = tpu.matmul %31, %33, %cst_24 {dimension_numbers = #tpu.dot_dimension_numbers<[1], [0], [0], [1], [0, 0, 1, 1], [], []>} : vector<8x256xbf16>, vector<256x256xbf16>, vector<8x256xf32> -> vector<8x256xf32>
    %c3_25 = arith.constant 3 : index
    %c0_26 = arith.constant 0 : index
    %c0_27 = arith.constant 0 : index
    %35 = vector.load %arg3[%c3_25, %c0_26, %c0_27] : memref<6x1x256xf32, #tpu.memory_space<vmem>>, vector<1x1x256xf32>
    %36 = vector.shape_cast %35 : vector<1x1x256xf32> to vector<1x256xf32>
    %37 = vector.broadcast %36 : vector<1x256xf32> to vector<8x256xf32>
    %38 = arith.addf %34, %37 : vector<8x256xf32>
    %cst_28 = arith.constant 0.000000e+00 : f32
    %39 = vector.broadcast %cst_28 : f32 to vector<8x256xf32>
    %40 = arith.maximumf %38, %39 : vector<8x256xf32>
    %41 = arith.truncf %40 : vector<8x256xf32> to vector<8x256xbf16>
    %c4 = arith.constant 4 : index
    %c0_29 = arith.constant 0 : index
    %c0_30 = arith.constant 0 : index
    %42 = vector.load %arg2[%c4, %c0_29, %c0_30] : memref<6x256x256xbf16, #tpu.memory_space<vmem>>, vector<1x256x256xbf16>
    %43 = vector.shape_cast %42 : vector<1x256x256xbf16> to vector<256x256xbf16>
    %cst_31 = arith.constant dense<0.000000e+00> : vector<8x256xf32>
    %44 = tpu.matmul %41, %43, %cst_31 {dimension_numbers = #tpu.dot_dimension_numbers<[1], [0], [0], [1], [0, 0, 1, 1], [], []>} : vector<8x256xbf16>, vector<256x256xbf16>, vector<8x256xf32> -> vector<8x256xf32>
    %c4_32 = arith.constant 4 : index
    %c0_33 = arith.constant 0 : index
    %c0_34 = arith.constant 0 : index
    %45 = vector.load %arg3[%c4_32, %c0_33, %c0_34] : memref<6x1x256xf32, #tpu.memory_space<vmem>>, vector<1x1x256xf32>
    %46 = vector.shape_cast %45 : vector<1x1x256xf32> to vector<1x256xf32>
    %47 = vector.broadcast %46 : vector<1x256xf32> to vector<8x256xf32>
    %48 = arith.addf %44, %47 : vector<8x256xf32>
    %cst_35 = arith.constant 0.000000e+00 : f32
    %49 = vector.broadcast %cst_35 : f32 to vector<8x256xf32>
    %50 = arith.maximumf %48, %49 : vector<8x256xf32>
    %51 = arith.truncf %50 : vector<8x256xf32> to vector<8x256xbf16>
    %c5 = arith.constant 5 : index
    %c0_36 = arith.constant 0 : index
    %c0_37 = arith.constant 0 : index
    %52 = vector.load %arg2[%c5, %c0_36, %c0_37] : memref<6x256x256xbf16, #tpu.memory_space<vmem>>, vector<1x256x256xbf16>
    %53 = vector.shape_cast %52 : vector<1x256x256xbf16> to vector<256x256xbf16>
    %cst_38 = arith.constant dense<0.000000e+00> : vector<8x256xf32>
    %54 = tpu.matmul %51, %53, %cst_38 {dimension_numbers = #tpu.dot_dimension_numbers<[1], [0], [0], [1], [0, 0, 1, 1], [], []>} : vector<8x256xbf16>, vector<256x256xbf16>, vector<8x256xf32> -> vector<8x256xf32>
    %c5_39 = arith.constant 5 : index
    %c0_40 = arith.constant 0 : index
    %c0_41 = arith.constant 0 : index
    %55 = vector.load %arg3[%c5_39, %c0_40, %c0_41] : memref<6x1x256xf32, #tpu.memory_space<vmem>>, vector<1x1x256xf32>
    %56 = vector.shape_cast %55 : vector<1x1x256xf32> to vector<1x256xf32>
    %57 = vector.broadcast %56 : vector<1x256xf32> to vector<8x256xf32>
    %58 = arith.addf %54, %57 : vector<8x256xf32>
    %c0_42 = arith.constant 0 : index
    %c0_43 = arith.constant 0 : index
    %59 = vector.load %arg4[%c0_42, %c0_43] : memref<8x256xf32, #tpu.memory_space<vmem>>, vector<8x256xf32>
    tpu.vector_store %arg4[%c0_42, %c0_43], %58 {strides = array<i32>} : memref<8x256xf32, #tpu.memory_space<vmem>>, vector<8x256xf32>,
    return
  }
  func.func @transform_0(%arg0: i32) -> (i32, i32) {
    %c0_i32 = arith.constant 0 : i32
    %c0_i32_0 = arith.constant 0 : i32
    return %arg0, %c0_i32 : i32, i32
  }
  func.func @transform_1(%arg0: i32) -> (i32, i32, i32) {
    %c0_i32 = arith.constant 0 : i32
    %c0_i32_0 = arith.constant 0 : i32
    %c0_i32_1 = arith.constant 0 : i32
    %c0_i32_2 = arith.constant 0 : i32
    return %c0_i32, %c0_i32_0, %c0_i32_1 : i32, i32, i32
  }
  func.func @transform_2(%arg0: i32) -> (i32, i32, i32) {
    %c0_i32 = arith.constant 0 : i32
    %c0_i32_0 = arith.constant 0 : i32
    %c0_i32_1 = arith.constant 0 : i32
    %c0_i32_2 = arith.constant 0 : i32
    return %c0_i32, %c0_i32_0, %c0_i32_1 : i32, i32, i32
  }
  func.func @transform_3(%arg0: i32) -> (i32, i32) {
    %c0_i32 = arith.constant 0 : i32
    %c0_i32_0 = arith.constant 0 : i32
    return %arg0, %c0_i32 : i32, i32
  }
}

</mosaic_0001>

<bundles_post_ra>
// kernel: tpu_custom_call.1
= control target key start
LH: loop header
LB: loop body
LE: loop exit
PB: predicated region body
PF: predicated region fallthrough
CT: control target
= control target key end

     0   :  { %8 = vsyncpa [#allocation3], 0  ;;  %s2250_s0 = inlined_call_operand.hbm [shape: f32[8,256], index: 0, kind: input, shape index: {}]   ;;  %s2251_s1 = inlined_call_operand.hbm [shape: bf16[6,256,256], index: 1, kind: input, shape index: {}]   ;;  %s2252_s2 = inlined_call_operand.hbm [shape: f32[6,1,256], index: 2, kind: input, shape index: {}]   ;;  %s2253_s3 = inlined_call_operand.hbm [shape: f32[8,256], index: 3, kind: output, shape index: {}]  }
   0x1   :  { %9 = vsyncpa [#allocation6], 0 }
   0x2   :  { %10 = vsyncpa [#allocation4], 0  ;;  %s2158_s12 = smov [#allocation5]   ;;  %s2064_s16 = scalar_lea.hbm %s2251_s1, 24576 }
   0x3   :  { %s26_s13 = sshll.u32 %s2158_s12, 4  ;;  %p2065_p0 = scmp.ne.s32.totalorder %s2251_s1, %s2064_s16  ;;  %s27_s13 = int_to_ptr.vmem [resolvable:$true] %s26_s13 }
   0x4   :  { %p2068_p1 = scmp.lt.u32.totalorder %s2064_s16, %s2251_s1 }
   0x6   :  { %p2070_p2 = pnand %p2068_p1, %p2065_p0 }
   0x8   :  { %2073 = shalt.err (!%p2070_p2)
}
   0x9   :  { %s2074_s21 = scalar_lea.vmem %s27_s13, 24576  ;;  %p2079_p4 = scmp.lt.s32.totalorder %s27_s13, %s27_s13 }
   0xa   :  { %p2075_p3 = scmp.ne.s32.totalorder %s27_s13, %s2074_s21  ;;  %p2080_p5 = scmp.lt.s32.totalorder %s2074_s21, %s2074_s21 }
   0xc   :  { %p2081_p6 = por %p2080_p5, %p2079_p4 }
   0xe   :  { %p2082_p7 = pnand %p2081_p6, %p2075_p3 }
  0x10   :  { %2085 = shalt.err (!%p2082_p7)
}
  0x11   :  { %s2159_s22 = smov 128   ;;  %s2160_s23 = smov 8  }
  0x12   :  { %32 = dma.hbm_to_vmem [thread:$0]  %s2251_s1, 24576, %s27_s13, [#allocation6], %s2159_s22, %s2159_s22, %s2160_s23  }
  0x13   :  { %s2161_s26 = smov [#allocation2]   ;;  %s2162_s28 = smov [#allocation7]  }
  0x14   :  { %s17_s27 = sshll.u32 %s2161_s26, 4  ;;  %s38_s29 = sshll.u32 %s2162_s28, 4  ;;  %s18_s27 = int_to_ptr.vmem [resolvable:$true] %s17_s27  ;;  %s39_s29 = int_to_ptr.vmem [resolvable:$true] %s38_s29 }
  0x15   :  { %s2086_s5 = scalar_lea.hbm %s2250_s0, 256 }
  0x16   :  { %p2087_p8 = scmp.ne.s32.totalorder %s2250_s0, %s2086_s5  ;;  %p2090_p9 = scmp.lt.u32.totalorder %s2086_s5, %s2250_s0 }
  0x18   :  { %p2092_p10 = pnand %p2090_p9, %p2087_p8 }
  0x1a   :  { %2095 = shalt.err (!%p2092_p10)
}
  0x1b   :  { %s2096_s1 = scalar_lea.vmem %s18_s27, 256  ;;  %p2101_p12 = scmp.lt.s32.totalorder %s18_s27, %s18_s27 }
  0x1c   :  { %p2097_p11 = scmp.ne.s32.totalorder %s18_s27, %s2096_s1  ;;  %p2102_p13 = scmp.lt.s32.totalorder %s2096_s1, %s2096_s1 }
  0x1e   :  { %p2103_p0 = por %p2102_p13, %p2101_p12 }
  0x20   :  { %p2104_p1 = pnand %p2103_p0, %p2097_p11 }
  0x22   :  { %2107 = shalt.err (!%p2104_p1)
}
  0x23   :  { %20 = dma.hbm_to_vmem [thread:$0]  %s2250_s0, 256, %s18_s27, [#allocation3]  }
  0x24   :  { %s2108_s14 = scalar_lea.hbm %s2252_s2, 192 }
  0x25   :  { %p2109_p2 = scmp.ne.s32.totalorder %s2252_s2, %s2108_s14  ;;  %p2112_p3 = scmp.lt.u32.totalorder %s2108_s14, %s2252_s2 }
  0x27   :  { %p2114_p4 = pnand %p2112_p3, %p2109_p2 }
  0x29   :  { %2117 = shalt.err (!%p2114_p4)
}
  0x2a   :  { %s2118_s19 = scalar_lea.vmem %s39_s29, 192  ;;  %p2123_p6 = scmp.lt.s32.totalorder %s39_s29, %s39_s29 }
  0x2b   :  { %p2119_p5 = scmp.ne.s32.totalorder %s39_s29, %s2118_s19  ;;  %p2124_p7 = scmp.lt.s32.totalorder %s2118_s19, %s2118_s19 }
  0x2d   :  { %p2125_p8 = por %p2124_p7, %p2123_p6 }
  0x2f   :  { %p2126_p9 = pnand %p2125_p8, %p2119_p5 }
  0x31   :  { %2129 = shalt.err (!%p2126_p9)
}
  0x32   :  { %s2163_s0 = smov 32   ;;  %s2164_s20 = smov 2  }
  0x33   :  { %44 = dma.hbm_to_vmem [thread:$0]  %s2252_s2, 192, %s39_s29, [#allocation6], %s2163_s0, %s2163_s0, %s2164_s20  }
  0x34   :  { %2152 = dma.done.wait [#allocation3], 256  }
  0x35   :  { %2153 = vsyncadd [#allocation3], 4294967040 }
  0x36   :  { %2154 = dma.done.wait [#allocation6], 24768  }
  0x37   :  { %2155 = vsyncadd [#allocation6], 4294942528  ;;  %v1776_v0 = vld [vmem:[#allocation5 + $0x4] ss:$8 sps:$4 sm:$0xff]   ;;  %v1778_v1 = vld [vmem:[#allocation5] ss:$8 sps:$4 sm:$0xff]  }
  0x38   :  { %262 = vmatprep.subr.bf16.mxu0 %v1776_v0  ;;  %v1779_v2 = vld [vmem:[#allocation5 + $0x14] ss:$8 sps:$4 sm:$0xff]   ;;  %v1781_v3 = vld [vmem:[#allocation5 + $0x10] ss:$8 sps:$4 sm:$0xff]   ;;  %v1782_v4 = vld [vmem:[#allocation5 + $0x24] ss:$8 sps:$4 sm:$0xff]  }
  0x39   :  { %263 = vmatpush1.bf16.msra.mxu0 %v1778_v1  ;;  %v1784_v5 = vld [vmem:[#allocation5 + $0x20] ss:$8 sps:$4 sm:$0xff]   ;;  %v1785_v6 = vld [vmem:[#allocation5 + $0x34] ss:$8 sps:$4 sm:$0xff]   ;;  %v1787_v7 = vld [vmem:[#allocation5 + $0x30] ss:$8 sps:$4 sm:$0xff]  }
  0x3a   :  { %264 = vmatprep.subr.bf16.mxu0 %v1779_v2  ;;  %v1788_v8 = vld [vmem:[#allocation5 + $0x44] ss:$8 sps:$4 sm:$0xff]   ;;  %v1790_v9 = vld [vmem:[#allocation5 + $0x40] ss:$8 sps:$4 sm:$0xff]   ;;  %v1791_v10 = vld [vmem:[#allocation5 + $0x54] ss:$8 sps:$4 sm:$0xff]  }
  0x3b   :  { %v1793_v11 = vld [vmem:[#allocation5 + $0x50] ss:$8 sps:$4 sm:$0xff]   ;;  %v1794_v12 = vld [vmem:[#allocation5 + $0x64] ss:$8 sps:$4 sm:$0xff]   ;;  %v1796_v13 = vld [vmem:[#allocation5 + $0x60] ss:$8 sps:$4 sm:$0xff]  }
  0x3c   :  { %v55_v14 = vld [vmem:[#allocation2 + $0x8] sm:$0xff]  ;;  %v1824_v16 = vld [vmem:[#allocation5 + $0x104] ss:$8 sps:$4 sm:$0xff]   ;;  %v1826_v17 = vld [vmem:[#allocation5 + $0x100] ss:$8 sps:$4 sm:$0xff]   ;;  %s2165_s2 = smov [#allocation8]  }
  0x3d   :  { %265 = vmatpush1.bf16.msra.mxu0 %v1781_v3  ;;  %v57_v15 = vpack.c.bf16 %v55_v14, %v55_v14  ;;  %v1797_v18 = vld [vmem:[#allocation5 + $0x74] ss:$8 sps:$4 sm:$0xff]   ;;  %v1799_v20 = vld [vmem:[#allocation5 + $0x70] ss:$8 sps:$4 sm:$0xff]   ;;  %513 = vmatprep.subr.bf16.mxu1 %v1824_v16  ;;  %v1830_v22 = vld [vmem:[#allocation5 + $0x124] ss:$8 sps:$4 sm:$0xff]  }
  0x3e   :  { %266 = vmatprep.subr.bf16.mxu0 %v1782_v4  ;;  %v1827_v19 = vld [vmem:[#allocation5 + $0x114] ss:$8 sps:$4 sm:$0xff]   ;;  %514 = vmatpush1.bf16.msra.mxu1 %v1826_v17  ;;  %v1829_v21 = vld [vmem:[#allocation5 + $0x110] ss:$8 sps:$4 sm:$0xff]   ;;  %v1800_v23 = vld [vmem:[#allocation5 + $0x84] ss:$8 sps:$4 sm:$0xff]  }
  0x3f   :  { %294 = vmatprep.mubr.bf16.mxu0 %v57_v15  ;;  %515 = vmatprep.subr.bf16.mxu1 %v1827_v19  ;;  %v1802_v24 = vld [vmem:[#allocation5 + $0x80] ss:$8 sps:$4 sm:$0xff]   ;;  %v1833_v26 = vld [vmem:[#allocation5 + $0x134] ss:$8 sps:$4 sm:$0xff]   ;;  %v1805_v28 = vld [vmem:[#allocation5 + $0x90] ss:$8 sps:$4 sm:$0xff]  }
  0x40   :  { %v1832_v25 = vld [vmem:[#allocation5 + $0x120] ss:$8 sps:$4 sm:$0xff]   ;;  %v1803_v27 = vld [vmem:[#allocation5 + $0x94] ss:$8 sps:$4 sm:$0xff]   ;;  %v1835_v29 = vld [vmem:[#allocation5 + $0x130] ss:$8 sps:$4 sm:$0xff]  }
  0x41   :  { %267 = vmatpush1.bf16.msra.mxu0 %v1784_v5  ;;  %v1836_v30 = vld [vmem:[#allocation5 + $0x144] ss:$8 sps:$4 sm:$0xff]   ;;  %v1808_v32 = vld [vmem:[#allocation5 + $0xa0] ss:$8 sps:$4 sm:$0xff]   ;;  %v1839_v34 = vld [vmem:[#allocation5 + $0x154] ss:$8 sps:$4 sm:$0xff]  }
  0x42   :  { %268 = vmatprep.subr.bf16.mxu0 %v1785_v6  ;;  %516 = vmatpush1.bf16.msra.mxu1 %v1829_v21  ;;  %v1806_v31 = vld [vmem:[#allocation5 + $0xa4] ss:$8 sps:$4 sm:$0xff]   ;;  %v1838_v33 = vld [vmem:[#allocation5 + $0x140] ss:$8 sps:$4 sm:$0xff]   ;;  %v1809_v35 = vld [vmem:[#allocation5 + $0xb4] ss:$8 sps:$4 sm:$0xff]  }
  0x43   :  { %517 = vmatprep.subr.bf16.mxu1 %v1830_v22  ;;  %v1841_v36 = vld [vmem:[#allocation5 + $0x150] ss:$8 sps:$4 sm:$0xff]   ;;  %v1842_v38 = vld [vmem:[#allocation5 + $0x164] ss:$8 sps:$4 sm:$0xff]   ;;  %v1844_v40 = vld [vmem:[#allocation5 + $0x160] ss:$8 sps:$4 sm:$0xff]  }
  0x44   :  { %v1811_v37 = vld [vmem:[#allocation5 + $0xb0] ss:$8 sps:$4 sm:$0xff]   ;;  %v1812_v39 = vld [vmem:[#allocation5 + $0xc4] ss:$8 sps:$4 sm:$0xff]   ;;  %v1814_v41 = vld [vmem:[#allocation5 + $0xc0] ss:$8 sps:$4 sm:$0xff]  }
  0x45   :  { %269 = vmatpush1.bf16.msra.mxu0 %v1787_v7  ;;  %v1845_v42 = vld [vmem:[#allocation5 + $0x174] ss:$8 sps:$4 sm:$0xff]   ;;  %v1847_v44 = vld [vmem:[#allocation5 + $0x170] ss:$8 sps:$4 sm:$0xff]   ;;  %v1848_v46 = vld [vmem:[#allocation5 + $0x184] ss:$8 sps:$4 sm:$0xff]  }
  0x46   :  { %270 = vmatprep.subr.bf16.mxu0 %v1788_v8  ;;  %518 = vmatpush1.bf16.msra.mxu1 %v1832_v25  ;;  %v1815_v43 = vld [vmem:[#allocation5 + $0xd4] ss:$8 sps:$4 sm:$0xff]   ;;  %v1817_v45 = vld [vmem:[#allocation5 + $0xd0] ss:$8 sps:$4 sm:$0xff]   ;;  %v1818_v47 = vld [vmem:[#allocation5 + $0xe4] ss:$8 sps:$4 sm:$0xff]  }
  0x47   :  { %519 = vmatprep.subr.bf16.mxu1 %v1833_v26  ;;  %v1850_v48 = vld [vmem:[#allocation5 + $0x180] ss:$8 sps:$4 sm:$0xff]   ;;  %v1851_v50 = vld [vmem:[#allocation5 + $0x194] ss:$8 sps:$4 sm:$0xff]   ;;  %v1853_v52 = vld [vmem:[#allocation5 + $0x190] ss:$8 sps:$4 sm:$0xff]  }
  0x48   :  { %v1820_v49 = vld [vmem:[#allocation5 + $0xe0] ss:$8 sps:$4 sm:$0xff]   ;;  %v1821_v51 = vld [vmem:[#allocation5 + $0xf4] ss:$8 sps:$4 sm:$0xff]   ;;  %v1823_v53 = vld [vmem:[#allocation5 + $0xf0] ss:$8 sps:$4 sm:$0xff]  }
  0x49   :  { %271 = vmatpush1.bf16.msra.mxu0 %v1790_v9  ;;  %v54_v54 = vld [vmem:[#allocation2] sm:$0xff]  ;;  %v1854_v55 = vld [vmem:[#allocation5 + $0x1a4] ss:$8 sps:$4 sm:$0xff]   ;;  %v1856_v56 = vld [vmem:[#allocation5 + $0x1a0] ss:$8 sps:$4 sm:$0xff]   ;;  %s1566_s23 = sshll.u32 %s2165_s2, 4  ;;  %s1567_s23 = int_to_ptr.vmem [resolvable:$true] %s1566_s23 }
  0x4a   :  { %272 = vmatprep.subr.bf16.mxu0 %v1791_v10  ;;  %520 = vmatpush1.bf16.msra.mxu1 %v1835_v29  ;;  %v1857_v57 = vld [vmem:[#allocation5 + $0x1b4] ss:$8 sps:$4 sm:$0xff]   ;;  %v56_v58 = vpack.c.bf16 %v54_v54, %v54_v54  ;;  %v1859_v59 = vld [vmem:[#allocation5 + $0x1b0] ss:$8 sps:$4 sm:$0xff]   ;;  %v1860_v60 = vld [vmem:[#allocation5 + $0x1c4] ss:$8 sps:$4 sm:$0xff]   ;;  %p2135_p11 = scmp.lt.s32.totalorder %s1567_s23, %s1567_s23 }
  0x4b   :  { %521 = vmatprep.subr.bf16.mxu1 %v1836_v30  ;;  %v1862_v61 = vld [vmem:[#allocation5 + $0x1c0] ss:$8 sps:$4 sm:$0xff]   ;;  %v1863_v62 = vld [vmem:[#allocation5 + $0x1d4] ss:$8 sps:$4 sm:$0xff]   ;;  %v1865_v63 = vld [vmem:[#allocation5 + $0x1d0] ss:$8 sps:$4 sm:$0xff]  }
  0x4c   :  { %v1866_v0 = vld [vmem:[#allocation5 + $0x1e4] ss:$8 sps:$4 sm:$0xff]   ;;  %v1868_v1 = vld [vmem:[#allocation5 + $0x1e0] ss:$8 sps:$4 sm:$0xff]   ;;  %v1869_v2 = vld [vmem:[#allocation5 + $0x1f4] ss:$8 sps:$4 sm:$0xff]  }
  0x4d   :  { %273 = vmatpush1.bf16.msra.mxu0 %v1793_v11  ;;  %v1871_v3 = vld [vmem:[#allocation5 + $0x1f0] ss:$8 sps:$4 sm:$0xff]   ;;  %v1872_v4 = vld [vmem:[#allocation5 + $0x200] ss:$8 sps:$4 sm:$0xff]   ;;  %v1874_v5 = vld [vmem:[#allocation5 + $0x204] ss:$8 sps:$4 sm:$0xff]  }
  0x4e   :  { %274 = vmatprep.subr.bf16.mxu0 %v1794_v12  ;;  %522 = vmatpush1.bf16.msra.mxu1 %v1838_v33  ;;  %v1877_v6 = vld [vmem:[#allocation5 + $0x214] ss:$8 sps:$4 sm:$0xff]   ;;  %v1875_v7 = vld [vmem:[#allocation5 + $0x210] ss:$8 sps:$4 sm:$0xff]   ;;  %v1880_v8 = vld [vmem:[#allocation5 + $0x224] ss:$8 sps:$4 sm:$0xff]  }
  0x4f   :  { %523 = vmatprep.subr.bf16.mxu1 %v1839_v34  ;;  %v1878_v9 = vld [vmem:[#allocation5 + $0x220] ss:$8 sps:$4 sm:$0xff]   ;;  %v1883_v10 = vld [vmem:[#allocation5 + $0x234] ss:$8 sps:$4 sm:$0xff]   ;;  %v1881_v11 = vld [vmem:[#allocation5 + $0x230] ss:$8 sps:$4 sm:$0xff]  }
  0x50   :  { %v1886_v12 = vld [vmem:[#allocation5 + $0x244] ss:$8 sps:$4 sm:$0xff]   ;;  %v1889_v14 = vld [vmem:[#allocation5 + $0x254] ss:$8 sps:$4 sm:$0xff]   ;;  %v1887_v15 = vld [vmem:[#allocation5 + $0x250] ss:$8 sps:$4 sm:$0xff]  }
  0x51   :  { %275 = vmatpush1.bf16.msra.mxu0 %v1796_v13  ;;  %v1884_v13 = vld [vmem:[#allocation5 + $0x240] ss:$8 sps:$4 sm:$0xff]   ;;  %v1892_v16 = vld [vmem:[#allocation5 + $0x264] ss:$8 sps:$4 sm:$0xff]   ;;  %v1893_v19 = vld [vmem:[#allocation5 + $0x270] ss:$8 sps:$4 sm:$0xff]  }
  0x52   :  { %276 = vmatprep.subr.bf16.mxu0 %v1797_v18  ;;  %524 = vmatpush1.bf16.msra.mxu1 %v1841_v36  ;;  %v1890_v17 = vld [vmem:[#allocation5 + $0x260] ss:$8 sps:$4 sm:$0xff]   ;;  %v1895_v18 = vld [vmem:[#allocation5 + $0x274] ss:$8 sps:$4 sm:$0xff]   ;;  %v1922_v54 = vld [vmem:[#allocation5 + $0x304] ss:$8 sps:$4 sm:$0xff]  }
  0x53   :  { %525 = vmatprep.subr.bf16.mxu1 %v1842_v38  ;;  %v1896_v21 = vld [vmem:[#allocation5 + $0x280] ss:$8 sps:$4 sm:$0xff]   ;;  %v1901_v22 = vld [vmem:[#allocation5 + $0x294] ss:$8 sps:$4 sm:$0xff]   ;;  %s2130_s24 = scalar_lea.vmem %s1567_s23, 256 }
  0x54   :  { %v1902_v25 = vld [vmem:[#allocation5 + $0x2a0] ss:$8 sps:$4 sm:$0xff]   ;;  %v1907_v26 = vld [vmem:[#allocation5 + $0x2b4] ss:$8 sps:$4 sm:$0xff]   ;;  %p2131_p10 = scmp.ne.s32.totalorder %s1567_s23, %s2130_s24  ;;  %p2136_p12 = scmp.lt.s32.totalorder %s2130_s24, %s2130_s24 }
  0x55   :  { %277 = vmatpush1.bf16.msra.mxu0 %v1799_v20  ;;  %v1898_v20 = vld [vmem:[#allocation5 + $0x284] ss:$8 sps:$4 sm:$0xff]   ;;  %v1908_v29 = vld [vmem:[#allocation5 + $0x2c0] ss:$8 sps:$4 sm:$0xff]   ;;  %v1913_v30 = vld [vmem:[#allocation5 + $0x2d4] ss:$8 sps:$4 sm:$0xff]  }
  0x56   :  { %278 = vmatprep.subr.bf16.mxu0 %v1800_v23  ;;  %526 = vmatpush1.bf16.msra.mxu1 %v1844_v40  ;;  %v1899_v23 = vld [vmem:[#allocation5 + $0x290] ss:$8 sps:$4 sm:$0xff]   ;;  %p2137_p13 = por %p2136_p12, %p2135_p11 }
  0x57   :  { %527 = vmatprep.subr.bf16.mxu1 %v1845_v42 }
  0x58   :  { %p2138_p0 = pnand %p2137_p13, %p2131_p10 }
  0x59   :  { %279 = vmatpush1.bf16.msra.mxu0 %v1802_v24  ;;  %v1904_v24 = vld [vmem:[#allocation5 + $0x2a4] ss:$8 sps:$4 sm:$0xff]  }
  0x5a   :  { %280 = vmatprep.subr.bf16.mxu0 %v1803_v27  ;;  %528 = vmatpush1.bf16.msra.mxu1 %v1847_v44  ;;  %v1905_v27 = vld [vmem:[#allocation5 + $0x2b0] ss:$8 sps:$4 sm:$0xff]  }
  0x5b   :  { %529 = vmatprep.subr.bf16.mxu1 %v1848_v46 }
  0x5d   :  { %281 = vmatpush1.bf16.msra.mxu0 %v1805_v28  ;;  %v1910_v28 = vld [vmem:[#allocation5 + $0x2c4] ss:$8 sps:$4 sm:$0xff]  }
  0x5e   :  { %282 = vmatprep.subr.bf16.mxu0 %v1806_v31  ;;  %530 = vmatpush1.bf16.msra.mxu1 %v1850_v48  ;;  %v1911_v31 = vld [vmem:[#allocation5 + $0x2d0] ss:$8 sps:$4 sm:$0xff]  }
  0x5f   :  { %531 = vmatprep.subr.bf16.mxu1 %v1851_v50  ;;  %v1914_v50 = vld [vmem:[#allocation5 + $0x2e0] ss:$8 sps:$4 sm:$0xff]  }
  0x61   :  { %283 = vmatpush1.bf16.msra.mxu0 %v1808_v32  ;;  %v92_v32 = vlaneseq }
  0x62   :  { %284 = vmatprep.subr.bf16.mxu0 %v1809_v35  ;;  %532 = vmatpush1.bf16.msra.mxu1 %v1853_v52  ;;  %v90_v35 = vld [vmem:[#allocation7] sm:$0x3]  ;;  %v1917_v52 = vld [vmem:[#allocation5 + $0x2f0] ss:$8 sps:$4 sm:$0xff]  }
  0x63   :  { %533 = vmatprep.subr.bf16.mxu1 %v1854_v55  ;;  %v93_v33 = vshrl.u32 %v92_v32, 7  ;;  %v1925_v55 = vld [vmem:[#allocation5 + $0x314] ss:$8 sps:$4 sm:$0xff]  }
  0x64   :  { %v1967_v32 = vld [vmem:[#allocation5 + $0x3f4] ss:$8 sps:$4 sm:$0xff]  }
  0x65   :  { %285 = vmatpush1.bf16.msra.mxu0 %v1811_v37  ;;  %v2222_v34 = vsub.s32 0, %v93_v33  ;;  %v2224_v36 = vsub.s32 1, %v93_v33  ;;  %v1965_v33 = vld [vmem:[#allocation5 + $0x3f0] ss:$8 sps:$4 sm:$0xff]  }
  0x66   :  { %286 = vmatprep.subr.bf16.mxu0 %v1812_v39  ;;  %534 = vmatpush1.bf16.msra.mxu1 %v1856_v56  ;;  %v1923_v56 = vld [vmem:[#allocation5 + $0x310] ss:$8 sps:$4 sm:$0xff]  }
  0x67   :  { %535 = vmatprep.subr.bf16.mxu1 %v1857_v57  ;;  %v95_v37 = vrot.slane %v90_v35, %v2222_v34  ;;  %v99_v38 = vrot.slane %v90_v35, %v2224_v36  ;;  %v1928_v57 = vld [vmem:[#allocation5 + $0x324] ss:$8 sps:$4 sm:$0xff]   ;;  %v1968_v35 = vld [vmem:[#allocation5 + $0x400] ss:$8 sps:$4 sm:$0xff]  }
  0x69   :  { %287 = vmatpush1.bf16.msra.mxu0 %v1814_v41 }
  0x6a   :  { %288 = vmatprep.subr.bf16.mxu0 %v1815_v43  ;;  %536 = vmatpush1.bf16.msra.mxu1 %v1859_v59  ;;  %v1931_v59 = vld [vmem:[#allocation5 + $0x334] ss:$8 sps:$4 sm:$0xff]  }
  0x6b   :  { %537 = vmatprep.subr.bf16.mxu1 %v1860_v60  ;;  %v1929_v60 = vld [vmem:[#allocation5 + $0x330] ss:$8 sps:$4 sm:$0xff]  }
  0x6d   :  { %289 = vmatpush1.bf16.msra.mxu0 %v1817_v45 }
  0x6e   :  { %290 = vmatprep.subr.bf16.mxu0 %v1818_v47  ;;  %538 = vmatpush1.bf16.msra.mxu1 %v1862_v61  ;;  %v1934_v61 = vld [vmem:[#allocation5 + $0x344] ss:$8 sps:$4 sm:$0xff]  }
  0x6f   :  { %539 = vmatprep.subr.bf16.mxu1 %v1863_v62  ;;  %v1932_v62 = vld [vmem:[#allocation5 + $0x340] ss:$8 sps:$4 sm:$0xff]  }
  0x71   :  { %291 = vmatpush1.bf16.msra.mxu0 %v1820_v49  ;;  %v1916_v49 = vld [vmem:[#allocation5 + $0x2e4] ss:$8 sps:$4 sm:$0xff]  }
  0x72   :  { %292 = vmatprep.subr.bf16.mxu0 %v1821_v51  ;;  %540 = vmatpush1.bf16.msra.mxu1 %v1865_v63  ;;  %v1919_v51 = vld [vmem:[#allocation5 + $0x2f4] ss:$8 sps:$4 sm:$0xff]  }
  0x73   :  { %541 = vmatprep.subr.bf16.mxu1 %v1866_v0  ;;  %v1937_v63 = vld [vmem:[#allocation5 + $0x354] ss:$8 sps:$4 sm:$0xff]   ;;  %v1935_v0 = vld [vmem:[#allocation5 + $0x350] ss:$8 sps:$4 sm:$0xff]  }
  0x75   :  { %293 = vmatpush1.bf16.msra.mxu0 %v1823_v53  ;;  %v1920_v53 = vld [vmem:[#allocation5 + $0x300] ss:$8 sps:$4 sm:$0xff]  }
  0x76   :  { %542 = vmatpush1.bf16.msra.mxu1 %v1868_v1  ;;  %764 = vmatprep.subr.bf16.mxu0 %v1874_v5  ;;  %v1940_v1 = vld [vmem:[#allocation5 + $0x364] ss:$8 sps:$4 sm:$0xff]  }
  0x77   :  { %543 = vmatprep.subr.bf16.mxu1 %v1869_v2  ;;  %v1938_v2 = vld [vmem:[#allocation5 + $0x360] ss:$8 sps:$4 sm:$0xff]   ;;  %v1946_v5 = vld [vmem:[#allocation5 + $0x384] ss:$8 sps:$4 sm:$0xff]  }
  0x78   :  { %295 = vmatmul.mubr.bf16.vlgmr.msra.gmra.mrb[0].mxu0 %v56_v58  ;;  %v1926_v58 = vld [vmem:[#allocation5 + $0x320] ss:$8 sps:$4 sm:$0xff]  }
  0x79   :  { %765 = vmatpush1.bf16.msra.mxu0 %v1872_v4  ;;  %v1941_v4 = vld [vmem:[#allocation5 + $0x370] ss:$8 sps:$4 sm:$0xff]  }
  0x7a   :  { %544 = vmatpush1.bf16.msra.mxu1 %v1871_v3  ;;  %766 = vmatprep.subr.bf16.mxu0 %v1877_v6  ;;  %v1943_v3 = vld [vmem:[#allocation5 + $0x374] ss:$8 sps:$4 sm:$0xff]   ;;  %v1944_v6 = vld [vmem:[#allocation5 + $0x380] ss:$8 sps:$4 sm:$0xff]  }
  0x7b   :  { %1015 = vmatprep.subr.bf16.mxu1 %v1922_v54  ;;  %v1997_v54 = vld [vmem:[#allocation5 + $0x494] ss:$8 sps:$4 sm:$0xff]  }
  0x7d   :  { %767 = vmatpush1.bf16.msra.mxu0 %v1875_v7  ;;  %v1949_v7 = vld [vmem:[#allocation5 + $0x394] ss:$8 sps:$4 sm:$0xff]  }
  0x7e   :  { %768 = vmatprep.subr.bf16.mxu0 %v1880_v8  ;;  %v1947_v8 = vld [vmem:[#allocation5 + $0x390] ss:$8 sps:$4 sm:$0xff]  }
  0x81   :  { %769 = vmatpush1.bf16.msra.mxu0 %v1878_v9  ;;  %v1952_v9 = vld [vmem:[#allocation5 + $0x3a4] ss:$8 sps:$4 sm:$0xff]  }
  0x82   :  { %770 = vmatprep.subr.bf16.mxu0 %v1883_v10  ;;  %v1950_v10 = vld [vmem:[#allocation5 + $0x3a0] ss:$8 sps:$4 sm:$0xff]  }
  0x85   :  { %771 = vmatpush1.bf16.msra.mxu0 %v1881_v11  ;;  %v1955_v11 = vld [vmem:[#allocation5 + $0x3b4] ss:$8 sps:$4 sm:$0xff]  }
  0x86   :  { %772 = vmatprep.subr.bf16.mxu0 %v1886_v12  ;;  %v1953_v12 = vld [vmem:[#allocation5 + $0x3b0] ss:$8 sps:$4 sm:$0xff]  }
  0x89   :  { %773 = vmatpush1.bf16.msra.mxu0 %v1884_v13  ;;  %v1958_v13 = vld [vmem:[#allocation5 + $0x3c4] ss:$8 sps:$4 sm:$0xff]  }
  0x8a   :  { %774 = vmatprep.subr.bf16.mxu0 %v1889_v14  ;;  %v1956_v14 = vld [vmem:[#allocation5 + $0x3c0] ss:$8 sps:$4 sm:$0xff]  }
  0x8d   :  { %775 = vmatpush1.bf16.msra.mxu0 %v1887_v15  ;;  %v1961_v15 = vld [vmem:[#allocation5 + $0x3d4] ss:$8 sps:$4 sm:$0xff]  }
  0x8e   :  { %776 = vmatprep.subr.bf16.mxu0 %v1892_v16  ;;  %v1959_v16 = vld [vmem:[#allocation5 + $0x3d0] ss:$8 sps:$4 sm:$0xff]  }
  0x91   :  { %777 = vmatpush1.bf16.msra.mxu0 %v1890_v17  ;;  %v341_v17 = vld [vmem:[#allocation7 + $0x2] sm:$0x3] }
  0x92   :  { %778 = vmatprep.subr.bf16.mxu0 %v1895_v18  ;;  %v346_v18 = vrot.slane %v341_v17, %v2222_v34 }
  0x95   :  { %779 = vmatpush1.bf16.msra.mxu0 %v1893_v19  ;;  %v350_v19 = vrot.slane %v341_v17, %v2224_v36  ;;  %v2016_v17 = vld [vmem:[#allocation5 + $0x500] ss:$8 sps:$4 sm:$0xff]  }
  0x96   :  { %780 = vmatprep.subr.bf16.mxu0 %v1898_v20 }
  0x99   :  { %781 = vmatpush1.bf16.msra.mxu0 %v1896_v21 }
  0x9a   :  { %782 = vmatprep.subr.bf16.mxu0 %v1901_v22 }
  0x9d   :  { %783 = vmatpush1.bf16.msra.mxu0 %v1899_v23 }
  0x9e   :  { %784 = vmatprep.subr.bf16.mxu0 %v1904_v24 }
  0xa1   :  { %785 = vmatpush1.bf16.msra.mxu0 %v1902_v25 }
  0xa2   :  { %786 = vmatprep.subr.bf16.mxu0 %v1907_v26 }
  0xa5   :  { %787 = vmatpush1.bf16.msra.mxu0 %v1905_v27 }
  0xa6   :  { %788 = vmatprep.subr.bf16.mxu0 %v1910_v28 }
  0xa9   :  { %789 = vmatpush1.bf16.msra.mxu0 %v1908_v29 }
  0xaa   :  { %790 = vmatprep.subr.bf16.mxu0 %v1913_v30  ;;  %v1964_v30 = vld [vmem:[#allocation5 + $0x3e4] ss:$8 sps:$4 sm:$0xff]  }
  0xad   :  { %791 = vmatpush1.bf16.msra.mxu0 %v1911_v31  ;;  %v1962_v31 = vld [vmem:[#allocation5 + $0x3e0] ss:$8 sps:$4 sm:$0xff]  }
  0xae   :  { %792 = vmatprep.subr.bf16.mxu0 %v1916_v49  ;;  %v1986_v49 = vld [vmem:[#allocation5 + $0x460] ss:$8 sps:$4 sm:$0xff]  }
  0xb1   :  { %793 = vmatpush1.bf16.msra.mxu0 %v1914_v50  ;;  %v1991_v50 = vld [vmem:[#allocation5 + $0x474] ss:$8 sps:$4 sm:$0xff]  }
  0xb2   :  { %794 = vmatprep.subr.bf16.mxu0 %v1919_v51  ;;  %v1989_v51 = vld [vmem:[#allocation5 + $0x470] ss:$8 sps:$4 sm:$0xff]  }
  0xb5   :  { %795 = vmatpush1.bf16.msra.mxu0 %v1917_v52  ;;  %v1994_v52 = vld [vmem:[#allocation5 + $0x484] ss:$8 sps:$4 sm:$0xff]  }
 0x14b   :  { %v296_v39 = vpop.f32.mrb[0].mxu0 }
 0x14c   :  { %v297_v40 = vadd.f32 %v296_v39, %v95_v37  ;;  %v298_v41 = vpop.f32.mrb[1].mxu0  ;;  %v1970_v37 = vld [vmem:[#allocation5 + $0x404] ss:$8 sps:$4 sm:$0xff]   ;;  %v1971_v39 = vld [vmem:[#allocation5 + $0x410] ss:$8 sps:$4 sm:$0xff]  }
 0x14d   :  { %v299_v42 = vadd.f32 %v298_v41, %v99_v38  ;;  %v300_v43 = vpop.f32.mrb[2].mxu0  ;;  %v1973_v38 = vld [vmem:[#allocation5 + $0x414] ss:$8 sps:$4 sm:$0xff]   ;;  %1266 = vmatprep.subr.bf16.mxu0 %v1970_v37  ;;  %v1974_v41 = vld [vmem:[#allocation5 + $0x420] ss:$8 sps:$4 sm:$0xff]  }
 0x14e   :  { %v303_v44 = vmax.f32 %v297_v40, 0.0  ;;  %v301_v45 = vpop.f32.mrb[3].mxu0  ;;  %v1976_v40 = vld [vmem:[#allocation5 + $0x424] ss:$8 sps:$4 sm:$0xff]   ;;  %v1977_v43 = vld [vmem:[#allocation5 + $0x430] ss:$8 sps:$4 sm:$0xff]  }
 0x14f   :  { %v304_v46 = vmax.f32 %v299_v42, 0.0  ;;  %v1979_v42 = vld [vmem:[#allocation5 + $0x434] ss:$8 sps:$4 sm:$0xff]   ;;  %v1980_v45 = vld [vmem:[#allocation5 + $0x440] ss:$8 sps:$4 sm:$0xff]  }
 0x150   :  { %v305_v48 = vpack.c.bf16 %v303_v44, %v303_v44  ;;  %v1982_v44 = vld [vmem:[#allocation5 + $0x444] ss:$8 sps:$4 sm:$0xff]   ;;  %v2045_v37 = vld [vmem:[#allocation5 + $0x594] ss:$8 sps:$4 sm:$0xff]  }
 0x151   :  { %v306_v47 = vpack.c.bf16 %v304_v46, %v304_v46  ;;  %v1985_v46 = vld [vmem:[#allocation5 + $0x454] ss:$8 sps:$4 sm:$0xff]  }
 0x153   :  { %545 = vmatprep.mubr.bf16.mxu1 %v306_v47  ;;  %v1983_v47 = vld [vmem:[#allocation5 + $0x450] ss:$8 sps:$4 sm:$0xff]  }
 0x154   :  { %546 = vmatmul.mubr.bf16.vlgmr.msra.gmra.mrb[0].mxu1 %v305_v48  ;;  %v1988_v48 = vld [vmem:[#allocation5 + $0x464] ss:$8 sps:$4 sm:$0xff]  }
 0x155   :  { %1016 = vmatpush1.bf16.msra.mxu1 %v1920_v53  ;;  %v1992_v53 = vld [vmem:[#allocation5 + $0x480] ss:$8 sps:$4 sm:$0xff]  }
 0x156   :  { %1017 = vmatprep.subr.bf16.mxu1 %v1925_v55  ;;  %v1995_v55 = vld [vmem:[#allocation5 + $0x490] ss:$8 sps:$4 sm:$0xff]  }
 0x159   :  { %1018 = vmatpush1.bf16.msra.mxu1 %v1923_v56  ;;  %v2000_v56 = vld [vmem:[#allocation5 + $0x4a4] ss:$8 sps:$4 sm:$0xff]  }
 0x15a   :  { %1019 = vmatprep.subr.bf16.mxu1 %v1928_v57  ;;  %v1998_v57 = vld [vmem:[#allocation5 + $0x4a0] ss:$8 sps:$4 sm:$0xff]  }
 0x15d   :  { %1020 = vmatpush1.bf16.msra.mxu1 %v1926_v58  ;;  %v2003_v58 = vld [vmem:[#allocation5 + $0x4b4] ss:$8 sps:$4 sm:$0xff]  }
 0x15e   :  { %1021 = vmatprep.subr.bf16.mxu1 %v1931_v59  ;;  %v2001_v59 = vld [vmem:[#allocation5 + $0x4b0] ss:$8 sps:$4 sm:$0xff]  }
 0x161   :  { %1022 = vmatpush1.bf16.msra.mxu1 %v1929_v60  ;;  %v2006_v60 = vld [vmem:[#allocation5 + $0x4c4] ss:$8 sps:$4 sm:$0xff]  }
 0x162   :  { %1023 = vmatprep.subr.bf16.mxu1 %v1934_v61  ;;  %v2004_v61 = vld [vmem:[#allocation5 + $0x4c0] ss:$8 sps:$4 sm:$0xff]  }
 0x165   :  { %1024 = vmatpush1.bf16.msra.mxu1 %v1932_v62  ;;  %v2009_v62 = vld [vmem:[#allocation5 + $0x4d4] ss:$8 sps:$4 sm:$0xff]  }
 0x166   :  { %1025 = vmatprep.subr.bf16.mxu1 %v1937_v63  ;;  %v2007_v63 = vld [vmem:[#allocation5 + $0x4d0] ss:$8 sps:$4 sm:$0xff]  }
 0x169   :  { %1026 = vmatpush1.bf16.msra.mxu1 %v1935_v0  ;;  %v592_v0 = vld [vmem:[#allocation7 + $0x4] sm:$0x3] }
 0x16a   :  { %1027 = vmatprep.subr.bf16.mxu1 %v1940_v1  ;;  %v597_v1 = vrot.slane %v592_v0, %v2222_v34 }
 0x16d   :  { %1028 = vmatpush1.bf16.msra.mxu1 %v1938_v2  ;;  %v601_v2 = vrot.slane %v592_v0, %v2224_v36  ;;  %v1094_v0 = vld [vmem:[#allocation7 + $0x8] sm:$0x3] }
 0x16e   :  { %1029 = vmatprep.subr.bf16.mxu1 %v1943_v3 }
 0x171   :  { %1030 = vmatpush1.bf16.msra.mxu1 %v1941_v4 }
 0x172   :  { %1031 = vmatprep.subr.bf16.mxu1 %v1946_v5 }
 0x175   :  { %1032 = vmatpush1.bf16.msra.mxu1 %v1944_v6 }
 0x176   :  { %1033 = vmatprep.subr.bf16.mxu1 %v1949_v7 }
 0x179   :  { %1034 = vmatpush1.bf16.msra.mxu1 %v1947_v8 }
 0x17a   :  { %1035 = vmatprep.subr.bf16.mxu1 %v1952_v9 }
 0x17d   :  { %1036 = vmatpush1.bf16.msra.mxu1 %v1950_v10 }
 0x17e   :  { %1037 = vmatprep.subr.bf16.mxu1 %v1955_v11 }
 0x181   :  { %1038 = vmatpush1.bf16.msra.mxu1 %v1953_v12 }
 0x182   :  { %1039 = vmatprep.subr.bf16.mxu1 %v1958_v13  ;;  %v2012_v13 = vld [vmem:[#allocation5 + $0x4e4] ss:$8 sps:$4 sm:$0xff]  }
 0x185   :  { %1040 = vmatpush1.bf16.msra.mxu1 %v1956_v14  ;;  %v2010_v14 = vld [vmem:[#allocation5 + $0x4e0] ss:$8 sps:$4 sm:$0xff]  }
 0x186   :  { %1041 = vmatprep.subr.bf16.mxu1 %v1961_v15  ;;  %v2015_v15 = vld [vmem:[#allocation5 + $0x4f4] ss:$8 sps:$4 sm:$0xff]  }
 0x189   :  { %1042 = vmatpush1.bf16.msra.mxu1 %v1959_v16  ;;  %v2013_v16 = vld [vmem:[#allocation5 + $0x4f0] ss:$8 sps:$4 sm:$0xff]  }
 0x18a   :  { %1043 = vmatprep.subr.bf16.mxu1 %v1964_v30  ;;  %v2034_v30 = vld [vmem:[#allocation5 + $0x560] ss:$8 sps:$4 sm:$0xff]  }
 0x18d   :  { %1044 = vmatpush1.bf16.msra.mxu1 %v1962_v31  ;;  %v2039_v31 = vld [vmem:[#allocation5 + $0x574] ss:$8 sps:$4 sm:$0xff]  }
 0x18e   :  { %1045 = vmatprep.subr.bf16.mxu1 %v1967_v32  ;;  %v2037_v32 = vld [vmem:[#allocation5 + $0x570] ss:$8 sps:$4 sm:$0xff]  }
 0x191   :  { %1046 = vmatpush1.bf16.msra.mxu1 %v1965_v33  ;;  %v2042_v33 = vld [vmem:[#allocation5 + $0x584] ss:$8 sps:$4 sm:$0xff]  }
 0x227   :  { %v547_v20 = vpop.f32.mrb[0].mxu1 }
 0x228   :  { %v548_v21 = vadd.f32 %v547_v20, %v346_v18  ;;  %v549_v22 = vpop.f32.mrb[1].mxu1  ;;  %v2018_v18 = vld [vmem:[#allocation5 + $0x504] ss:$8 sps:$4 sm:$0xff]   ;;  %v2019_v20 = vld [vmem:[#allocation5 + $0x510] ss:$8 sps:$4 sm:$0xff]  }
 0x229   :  { %v550_v23 = vadd.f32 %v549_v22, %v350_v19  ;;  %v551_v24 = vpop.f32.mrb[2].mxu1  ;;  %v2021_v19 = vld [vmem:[#allocation5 + $0x514] ss:$8 sps:$4 sm:$0xff]   ;;  %1517 = vmatprep.subr.bf16.mxu1 %v2018_v18  ;;  %v2022_v22 = vld [vmem:[#allocation5 + $0x520] ss:$8 sps:$4 sm:$0xff]  }
 0x22a   :  { %v554_v25 = vmax.f32 %v548_v21, 0.0  ;;  %v552_v26 = vpop.f32.mrb[3].mxu1  ;;  %v2024_v21 = vld [vmem:[#allocation5 + $0x524] ss:$8 sps:$4 sm:$0xff]   ;;  %v2025_v24 = vld [vmem:[#allocation5 + $0x530] ss:$8 sps:$4 sm:$0xff]  }
 0x22b   :  { %v555_v27 = vmax.f32 %v550_v23, 0.0  ;;  %v2027_v23 = vld [vmem:[#allocation5 + $0x534] ss:$8 sps:$4 sm:$0xff]   ;;  %v2028_v26 = vld [vmem:[#allocation5 + $0x540] ss:$8 sps:$4 sm:$0xff]  }
 0x22c   :  { %v556_v29 = vpack.c.bf16 %v554_v25, %v554_v25  ;;  %v2030_v25 = vld [vmem:[#allocation5 + $0x544] ss:$8 sps:$4 sm:$0xff]  }
 0x22d   :  { %v557_v28 = vpack.c.bf16 %v555_v27, %v555_v27  ;;  %v2033_v27 = vld [vmem:[#allocation5 + $0x554] ss:$8 sps:$4 sm:$0xff]  }
 0x22f   :  { %796 = vmatprep.mubr.bf16.mxu0 %v557_v28  ;;  %v2031_v28 = vld [vmem:[#allocation5 + $0x550] ss:$8 sps:$4 sm:$0xff]  }
 0x230   :  { %797 = vmatmul.mubr.bf16.vlgmr.msra.gmra.mrb[4].mxu0 %v556_v29  ;;  %v2036_v29 = vld [vmem:[#allocation5 + $0x564] ss:$8 sps:$4 sm:$0xff]  }
 0x231   :  { %1267 = vmatpush1.bf16.msra.mxu0 %v1968_v35  ;;  %v2040_v35 = vld [vmem:[#allocation5 + $0x580] ss:$8 sps:$4 sm:$0xff]  }
 0x232   :  { %1268 = vmatprep.subr.bf16.mxu0 %v1973_v38  ;;  %v2043_v38 = vld [vmem:[#allocation5 + $0x590] ss:$8 sps:$4 sm:$0xff]  }
 0x235   :  { %1269 = vmatpush1.bf16.msra.mxu0 %v1971_v39  ;;  %v2048_v39 = vld [vmem:[#allocation5 + $0x5a4] ss:$8 sps:$4 sm:$0xff]  }
 0x236   :  { %1270 = vmatprep.subr.bf16.mxu0 %v1976_v40  ;;  %v2046_v40 = vld [vmem:[#allocation5 + $0x5a0] ss:$8 sps:$4 sm:$0xff]  }
 0x239   :  { %1271 = vmatpush1.bf16.msra.mxu0 %v1974_v41  ;;  %v2051_v41 = vld [vmem:[#allocation5 + $0x5b4] ss:$8 sps:$4 sm:$0xff]  }
 0x23a   :  { %1272 = vmatprep.subr.bf16.mxu0 %v1979_v42  ;;  %v2049_v42 = vld [vmem:[#allocation5 + $0x5b0] ss:$8 sps:$4 sm:$0xff]  }
 0x23d   :  { %1273 = vmatpush1.bf16.msra.mxu0 %v1977_v43  ;;  %v2054_v43 = vld [vmem:[#allocation5 + $0x5c4] ss:$8 sps:$4 sm:$0xff]  }
 0x23e   :  { %1274 = vmatprep.subr.bf16.mxu0 %v1982_v44  ;;  %v2052_v44 = vld [vmem:[#allocation5 + $0x5c0] ss:$8 sps:$4 sm:$0xff]  }
 0x241   :  { %1275 = vmatpush1.bf16.msra.mxu0 %v1980_v45  ;;  %v2057_v45 = vld [vmem:[#allocation5 + $0x5d4] ss:$8 sps:$4 sm:$0xff]  }
 0x242   :  { %1276 = vmatprep.subr.bf16.mxu0 %v1985_v46  ;;  %v2055_v46 = vld [vmem:[#allocation5 + $0x5d0] ss:$8 sps:$4 sm:$0xff]  }
 0x245   :  { %1277 = vmatpush1.bf16.msra.mxu0 %v1983_v47  ;;  %v843_v47 = vld [vmem:[#allocation7 + $0x6] sm:$0x3] }
 0x246   :  { %1278 = vmatprep.subr.bf16.mxu0 %v1988_v48  ;;  %v848_v48 = vrot.slane %v843_v47, %v2222_v34 }
 0x249   :  { %1279 = vmatpush1.bf16.msra.mxu0 %v1986_v49  ;;  %v852_v49 = vrot.slane %v843_v47, %v2224_v36 }
 0x24a   :  { %1280 = vmatprep.subr.bf16.mxu0 %v1991_v50 }
 0x24d   :  { %1281 = vmatpush1.bf16.msra.mxu0 %v1989_v51 }
 0x24e   :  { %1282 = vmatprep.subr.bf16.mxu0 %v1994_v52 }
 0x251   :  { %1283 = vmatpush1.bf16.msra.mxu0 %v1992_v53 }
 0x252   :  { %1284 = vmatprep.subr.bf16.mxu0 %v1997_v54 }
 0x255   :  { %1285 = vmatpush1.bf16.msra.mxu0 %v1995_v55 }
 0x256   :  { %1286 = vmatprep.subr.bf16.mxu0 %v2000_v56 }
 0x259   :  { %1287 = vmatpush1.bf16.msra.mxu0 %v1998_v57 }
 0x25a   :  { %1288 = vmatprep.subr.bf16.mxu0 %v2003_v58 }
 0x25d   :  { %1289 = vmatpush1.bf16.msra.mxu0 %v2001_v59 }
 0x25e   :  { %1290 = vmatprep.subr.bf16.mxu0 %v2006_v60  ;;  %v2060_v60 = vld [vmem:[#allocation5 + $0x5e4] ss:$8 sps:$4 sm:$0xff]  }
 0x261   :  { %1291 = vmatpush1.bf16.msra.mxu0 %v2004_v61  ;;  %v2058_v61 = vld [vmem:[#allocation5 + $0x5e0] ss:$8 sps:$4 sm:$0xff]  }
 0x262   :  { %1292 = vmatprep.subr.bf16.mxu0 %v2009_v62  ;;  %v2063_v62 = vld [vmem:[#allocation5 + $0x5f4] ss:$8 sps:$4 sm:$0xff]  }
 0x265   :  { %1293 = vmatpush1.bf16.msra.mxu0 %v2007_v63  ;;  %v2061_v63 = vld [vmem:[#allocation5 + $0x5f0] ss:$8 sps:$4 sm:$0xff]  }
 0x266   :  { %1294 = vmatprep.subr.bf16.mxu0 %v2012_v13  ;;  %v1345_v13 = vld [vmem:[#allocation7 + $0xa] sm:$0x3] }
 0x269   :  { %1295 = vmatpush1.bf16.msra.mxu0 %v2010_v14  ;;  %v1350_v14 = vrot.slane %v1345_v13, %v2222_v34 }
 0x26a   :  { %1296 = vmatprep.subr.bf16.mxu0 %v2015_v15  ;;  %v1354_v15 = vrot.slane %v1345_v13, %v2224_v36 }
 0x26d   :  { %1297 = vmatpush1.bf16.msra.mxu0 %v2013_v16 }
 0x303   :  { %v798_v3 = vpop.f32.mrb[4].mxu0 }
 0x304   :  { %v799_v4 = vadd.f32 %v798_v3, %v597_v1  ;;  %v800_v5 = vpop.f32.mrb[5].mxu0  ;;  %v1099_v1 = vrot.slane %v1094_v0, %v2222_v34 }
 0x305   :  { %v801_v6 = vadd.f32 %v800_v5, %v601_v2  ;;  %v802_v7 = vpop.f32.mrb[6].mxu0  ;;  %v1103_v2 = vrot.slane %v1094_v0, %v2224_v36 }
 0x306   :  { %v805_v8 = vmax.f32 %v799_v4, 0.0  ;;  %v803_v9 = vpop.f32.mrb[7].mxu0 }
 0x307   :  { %v806_v10 = vmax.f32 %v801_v6, 0.0 }
 0x308   :  { %v807_v12 = vpack.c.bf16 %v805_v8, %v805_v8 }
 0x309   :  { %v808_v11 = vpack.c.bf16 %v806_v10, %v806_v10 }
 0x30b   :  { %1047 = vmatprep.mubr.bf16.mxu1 %v808_v11 }
 0x30c   :  { %1048 = vmatmul.mubr.bf16.vlgmr.msra.gmra.mrb[4].mxu1 %v807_v12 }
 0x30d   :  { %1518 = vmatpush1.bf16.msra.mxu1 %v2016_v17 }
 0x30e   :  { %1519 = vmatprep.subr.bf16.mxu1 %v2021_v19 }
 0x311   :  { %1520 = vmatpush1.bf16.msra.mxu1 %v2019_v20 }
 0x312   :  { %1521 = vmatprep.subr.bf16.mxu1 %v2024_v21 }
 0x315   :  { %1522 = vmatpush1.bf16.msra.mxu1 %v2022_v22 }
 0x316   :  { %1523 = vmatprep.subr.bf16.mxu1 %v2027_v23 }
 0x319   :  { %1524 = vmatpush1.bf16.msra.mxu1 %v2025_v24 }
 0x31a   :  { %1525 = vmatprep.subr.bf16.mxu1 %v2030_v25 }
 0x31d   :  { %1526 = vmatpush1.bf16.msra.mxu1 %v2028_v26 }
 0x31e   :  { %1527 = vmatprep.subr.bf16.mxu1 %v2033_v27 }
 0x321   :  { %1528 = vmatpush1.bf16.msra.mxu1 %v2031_v28 }
 0x322   :  { %1529 = vmatprep.subr.bf16.mxu1 %v2036_v29 }
 0x325   :  { %1530 = vmatpush1.bf16.msra.mxu1 %v2034_v30 }
 0x326   :  { %1531 = vmatprep.subr.bf16.mxu1 %v2039_v31 }
 0x329   :  { %1532 = vmatpush1.bf16.msra.mxu1 %v2037_v32 }
 0x32a   :  { %1533 = vmatprep.subr.bf16.mxu1 %v2042_v33 }
 0x32d   :  { %1534 = vmatpush1.bf16.msra.mxu1 %v2040_v35 }
 0x32e   :  { %1535 = vmatprep.subr.bf16.mxu1 %v2045_v37 }
 0x331   :  { %1536 = vmatpush1.bf16.msra.mxu1 %v2043_v38 }
 0x332   :  { %1537 = vmatprep.subr.bf16.mxu1 %v2048_v39 }
 0x335   :  { %1538 = vmatpush1.bf16.msra.mxu1 %v2046_v40 }
 0x336   :  { %1539 = vmatprep.subr.bf16.mxu1 %v2051_v41 }
 0x339   :  { %1540 = vmatpush1.bf16.msra.mxu1 %v2049_v42 }
 0x33a   :  { %1541 = vmatprep.subr.bf16.mxu1 %v2054_v43 }
 0x33d   :  { %1542 = vmatpush1.bf16.msra.mxu1 %v2052_v44 }
 0x33e   :  { %1543 = vmatprep.subr.bf16.mxu1 %v2057_v45 }
 0x341   :  { %1544 = vmatpush1.bf16.msra.mxu1 %v2055_v46 }
 0x342   :  { %1545 = vmatprep.subr.bf16.mxu1 %v2060_v60 }
 0x345   :  { %1546 = vmatpush1.bf16.msra.mxu1 %v2058_v61 }
 0x346   :  { %1547 = vmatprep.subr.bf16.mxu1 %v2063_v62 }
 0x349   :  { %1548 = vmatpush1.bf16.msra.mxu1 %v2061_v63 }
 0x3df   :  { %v1049_v50 = vpop.f32.mrb[4].mxu1 }
 0x3e0   :  { %v1050_v51 = vadd.f32 %v1049_v50, %v848_v48  ;;  %v1051_v52 = vpop.f32.mrb[5].mxu1 }
 0x3e1   :  { %v1052_v53 = vadd.f32 %v1051_v52, %v852_v49  ;;  %v1053_v54 = vpop.f32.mrb[6].mxu1 }
 0x3e2   :  { %v1056_v55 = vmax.f32 %v1050_v51, 0.0  ;;  %v1054_v56 = vpop.f32.mrb[7].mxu1 }
 0x3e3   :  { %v1057_v57 = vmax.f32 %v1052_v53, 0.0 }
 0x3e4   :  { %v1058_v59 = vpack.c.bf16 %v1056_v55, %v1056_v55 }
 0x3e5   :  { %v1059_v58 = vpack.c.bf16 %v1057_v57, %v1057_v57 }
 0x3e7   :  { %1298 = vmatprep.mubr.bf16.mxu0 %v1059_v58 }
 0x3e8   :  { %1299 = vmatmul.mubr.bf16.vlgmr.msra.gmra.mrb[8].mxu0 %v1058_v59 }
 0x4bb   :  { %v1300_v3 = vpop.f32.mrb[8].mxu0 }
 0x4bc   :  { %v1301_v4 = vadd.f32 %v1300_v3, %v1099_v1  ;;  %v1302_v5 = vpop.f32.mrb[9].mxu0 }
 0x4bd   :  { %v1303_v6 = vadd.f32 %v1302_v5, %v1103_v2  ;;  %v1304_v7 = vpop.f32.mrb[10].mxu0 }
 0x4be   :  { %v1307_v8 = vmax.f32 %v1301_v4, 0.0  ;;  %v1305_v9 = vpop.f32.mrb[11].mxu0 }
 0x4bf   :  { %v1308_v10 = vmax.f32 %v1303_v6, 0.0 }
 0x4c0   :  { %v1309_v12 = vpack.c.bf16 %v1307_v8, %v1307_v8 }
 0x4c1   :  { %v1310_v11 = vpack.c.bf16 %v1308_v10, %v1308_v10 }
 0x4c3   :  { %1549 = vmatprep.mubr.bf16.mxu1 %v1310_v11 }
 0x4c4   :  { %1550 = vmatmul.mubr.bf16.vlgmr.msra.gmra.mrb[8].mxu1 %v1309_v12 }
 0x597   :  { %v1551_v16 = vpop.f32.mrb[8].mxu1 }
 0x598   :  { %v1552_v17 = vadd.f32 %v1551_v16, %v1350_v14  ;;  %v1553_v18 = vpop.f32.mrb[9].mxu1 }
 0x599   :  { %v1554_v19 = vadd.f32 %v1553_v18, %v1354_v15  ;;  %v1555_v20 = vpop.f32.mrb[10].mxu1 }
 0x59a   :  { %1558 = vst [vmem:[#allocation8] sm:$0xff] %v1552_v17  ;;  %v1556_v21 = vpop.f32.mrb[11].mxu1 }
 0x59b   :  { %1559 = vst [vmem:[#allocation8 + $0x8] sm:$0xff] %v1554_v19 }
 0x59c   :  { %2141 = shalt.err (!%p2138_p0)
}
 0x59d   :  { %s2142_s27 = scalar_lea.hbm %s2253_s3, 256 }
 0x59e   :  { %p2143_p1 = scmp.ne.s32.totalorder %s2253_s3, %s2142_s27  ;;  %p2146_p2 = scmp.lt.u32.totalorder %s2142_s27, %s2253_s3 }
 0x5a0   :  { %p2148_p3 = pnand %p2146_p2, %p2143_p1 }
 0x5a2   :  { %2151 = shalt.err (!%p2148_p3)
}
 0x5a3   :  { %1569 = dma.vmem_to_hbm [thread:$0]  %s1567_s23, 256, %s2253_s3, [#allocation4]  }
 0x5a4   :  { %2156 = dma.done.wait [#allocation4], 256  }
 0x5a5   :  { %2157 = vsyncadd [#allocation4], 4294967040 }
 0x5a6   :  { %1573 = vsyncpa [#allocation3], 1 }
 0x5a7   :  { %1574 = vsyncpa [#allocation6], 1 }
 0x5a8   :  { %1575 = vsyncpa [#allocation4], 1 }

</bundles_post_ra>
